<compile_context>
chip_gen: v6e
topology: v6e:2x2x1
jax: 0.10.0
libtpu: 0.0.40
codegen_flags: <defaults>
</compile_context>

<pallas_src>
import functools

import jax
import jax.numpy as jnp
from jax.experimental import pallas as pl
from jax.experimental.pallas import tpu as pltpu


def _self_attention_kernel(x_ref, w_ref, b_ref, o_ref, *, batch, seq, dk_pad, d_k):
    # x_ref: (B*S, E) bf16 | w_ref: (E, 3*dk_pad) bf16 | b_ref: (1, 3*dk_pad) f32
    # o_ref: (B, S, d_k) f32 (unpadded output -> no extra HBM traffic / wrapper slice)
    x = x_ref[...]

    # One fused QKV projection on the MXU (f32 accumulation), bias added in f32.
    proj = jnp.dot(x, w_ref[...], preferred_element_type=jnp.float32) + b_ref[...]

    # Static 128-aligned lane slices; splitting rows back into (B, S, .) keeps the
    # (8, 128) tile structure, so the reshape is a free relayout.
    q = proj[:, :dk_pad].reshape(batch, seq, dk_pad)        # carries 1/sqrt(d_k) already
    k = proj[:, dk_pad:2 * dk_pad].reshape(batch, seq, dk_pad)
    v = proj[:, 2 * dk_pad:].reshape(batch, seq, dk_pad)

    # Batched scores: contract last dims of Q and K directly (no transpose materialized).
    s = jnp.einsum('bqd,bkd->bqk', q.astype(jnp.bfloat16), k.astype(jnp.bfloat16),
                   preferred_element_type=jnp.float32)      # (B, S, S) f32

    # Numerically stable softmax numerator in f32; normalization deferred past the
    # PV matmul so we scale (B,S,dk_pad) values instead of the (B,S,S) score matrix.
    m = jnp.max(s, axis=-1, keepdims=True)
    p = jnp.exp(s - m)
    denom = jnp.sum(p, axis=-1, keepdims=True)              # (B, S, 1) f32

    pv = jnp.einsum('bqk,bkd->bqd', p.astype(jnp.bfloat16), v.astype(jnp.bfloat16),
                    preferred_element_type=jnp.float32)     # (B, S, dk_pad) f32

    out = pv * pl.reciprocal(denom, approx=False)           # exact reciprocal (tiny vector)
    o_ref[...] = out[:, :, :d_k].astype(o_ref.dtype)        # drop lane padding before store


def self_attention(x, wq, bq, wk, bk, wv, bv):
    """x: (B, S, E) f32; w*: (E, d_k) f32; b*: (1, d_k) f32. Returns (B, S, d_k) f32."""
    B, S, E = x.shape
    d_k = wq.shape[1]
    scale = 1.0 / (float(d_k) ** 0.5)

    # Pad d_k to a lane-dense multiple of 128 for in-kernel intermediates only.
    dk_pad = ((d_k + 127) // 128) * 128
    pad = lambda a: jnp.pad(a, ((0, 0), (0, dk_pad - d_k)))

    # Fold the attention scale into the Q projection, then fuse Q/K/V weights & biases.
    # TODO(synk): if this module is used per-head, fuse all heads into one call
    # (w_fused of shape (E, 3*H*d_k)) so the lane dim is naturally >=128 without padding.
    w_fused = jnp.concatenate(
        [pad(wq * scale), pad(wk), pad(wv)], axis=1).astype(jnp.bfloat16)
    b_fused = jnp.concatenate(
        [pad(bq * scale), pad(bk), pad(bv)], axis=1).astype(jnp.float32)

    # Fold batch into MXU rows: one projection matmul over all B*S tokens.
    x_bf = x.reshape(B * S, E).astype(jnp.bfloat16)

    cost = pl.CostEstimate(
        flops=2 * (B * S) * E * (3 * dk_pad) + 2 * (2 * B * S * S * dk_pad),
        transcendentals=B * S * S,
        bytes_accessed=(x_bf.size * 2 + w_fused.size * 2 + b_fused.size * 4
                        + B * S * d_k * 4),
    )

    kernel = functools.partial(_self_attention_kernel,
                               batch=B, seq=S, dk_pad=dk_pad, d_k=d_k)

    # Single grid step: batch is folded, so no per-batch grid/DMA overhead.
    return pl.pallas_call(
        kernel,
        out_shape=jax.ShapeDtypeStruct((B, S, d_k), x.dtype),
        grid=(1,),
        in_specs=[
            pl.BlockSpec((B * S, E), lambda i: (0, 0)),          # tokens x embedding
            pl.BlockSpec((E, 3 * dk_pad), lambda i: (0, 0)),     # fused QKV weights
            pl.BlockSpec((1, 3 * dk_pad), lambda i: (0, 0)),     # fused QKV biases
        ],
        out_specs=pl.BlockSpec((B, S, d_k), lambda i: (0, 0, 0)),
        compiler_params=pltpu.CompilerParams(dimension_semantics=("arbitrary",)),
        cost_estimate=cost,
    )(x_bf, w_fused, b_fused)


def _reference(x, wq, bq, wk, bk, wv, bv):
    d_k = wq.shape[1]
    q = x @ wq + bq
    k = x @ wk + bk
    v = x @ wv + bv
    w = (q @ jnp.swapaxes(k, -2, -1)) / (d_k ** 0.5)
    return jax.nn.softmax(w, axis=-1) @ v


if __name__ == "__main__":
    # Small shapes consistent with the module: batch=2, seq=8, embedding_dim=32, d_k=16.
    B, S, E, d_k = 2, 8, 32, 16

    key = jax.random.PRNGKey(0)
    kx, kwq, kbq, kwk, kbk, kwv, kbv = jax.random.split(key, 7)

    x = jax.random.normal(kx, (B, S, E), dtype=jnp.float32)

    # Deterministic parameter init mimicking nn.Linear's U(-1/sqrt(E), 1/sqrt(E)).
    bound = 1.0 / (E ** 0.5)
    wq = jax.random.uniform(kwq, (E, d_k), jnp.float32, -bound, bound)
    bq = jax.random.uniform(kbq, (1, d_k), jnp.float32, -bound, bound)
    wk = jax.random.uniform(kwk, (E, d_k), jnp.float32, -bound, bound)
    bk = jax.random.uniform(kbk, (1, d_k), jnp.float32, -bound, bound)
    wv = jax.random.uniform(kwv, (E, d_k), jnp.float32, -bound, bound)
    bv = jax.random.uniform(kbv, (1, d_k), jnp.float32, -bound, bound)

    out = self_attention(x, wq, bq, wk, bk, wv, bv)
    out = jax.block_until_ready(out)

    ref = _reference(x, wq, bq, wk, bk, wv, bv)
    assert out.shape == (B, S, d_k)
    # Exact reciprocal + f32 accumulation leave bf16 input casts as the only error source.
    assert jnp.allclose(out, ref, atol=2e-2, rtol=2e-2), "mismatch vs reference"

    print("KERNEL_OK")
</pallas_src>

<mosaic_0001>
module attributes {stable_mosaic.version = 11 : i64} {
  func.func @_self_attention_kernel(%arg0: i32, %arg1: memref<16x32xbf16, #tpu.memory_space<vmem>>, %arg2: memref<32x384xbf16, #tpu.memory_space<vmem>>, %arg3: memref<1x384xf32, #tpu.memory_space<vmem>>, %arg4: memref<2x8x16xf32, #tpu.memory_space<vmem>>) attributes {dimension_semantics = [#tpu.dimension_semantics<arbitrary>], iteration_bounds = array<i64: 1>, scalar_prefetch = 0 : i64, scratch_operands = 0 : i64, tpu.core_type = #tpu.core_type<tc>, window_params = [{pipeline_mode = #tpu.pipeline_mode<synchronous>, transform_indices = @transform_0, window_bounds = array<i64: 16, 32>}, {pipeline_mode = #tpu.pipeline_mode<synchronous>, transform_indices = @transform_1, window_bounds = array<i64: 32, 384>}, {pipeline_mode = #tpu.pipeline_mode<synchronous>, transform_indices = @transform_2, window_bounds = array<i64: 1, 384>}, {pipeline_mode = #tpu.pipeline_mode<synchronous>, transform_indices = @transform_3, window_bounds = array<i64: 2, 8, 16>}]} {
    %c0 = arith.constant 0 : index
    %c0_0 = arith.constant 0 : index
    %0 = vector.load %arg1[%c0, %c0_0] : memref<16x32xbf16, #tpu.memory_space<vmem>>, vector<16x32xbf16>
    %c0_1 = arith.constant 0 : index
    %c0_2 = arith.constant 0 : index
    %1 = vector.load %arg2[%c0_1, %c0_2] : memref<32x384xbf16, #tpu.memory_space<vmem>>, vector<32x384xbf16>
    %cst = arith.constant dense<0.000000e+00> : vector<16x384xf32>
    %2 = tpu.matmul %0, %1, %cst {dimension_numbers = #tpu.dot_dimension_numbers<[1], [0], [0], [1], [0, 0, 1, 1], [], []>} : vector<16x32xbf16>, vector<32x384xbf16>, vector<16x384xf32> -> vector<16x384xf32>
    %c0_3 = arith.constant 0 : index
    %c0_4 = arith.constant 0 : index
    %3 = vector.load %arg3[%c0_3, %c0_4] : memref<1x384xf32, #tpu.memory_space<vmem>>, vector<1x384xf32>
    %4 = vector.broadcast %3 : vector<1x384xf32> to vector<16x384xf32>
    %5 = arith.addf %2, %4 : vector<16x384xf32>
    %6 = vector.extract_strided_slice %5 {offsets = [0, 0], sizes = [16, 128], strides = [1, 1]} : vector<16x384xf32> to vector<16x128xf32>
    %7 = vector.shape_cast %6 : vector<16x128xf32> to vector<2x8x128xf32>
    %8 = vector.extract_strided_slice %5 {offsets = [0, 128], sizes = [16, 128], strides = [1, 1]} : vector<16x384xf32> to vector<16x128xf32>
    %9 = vector.shape_cast %8 : vector<16x128xf32> to vector<2x8x128xf32>
    %10 = vector.extract_strided_slice %5 {offsets = [0, 256], sizes = [16, 128], strides = [1, 1]} : vector<16x384xf32> to vector<16x128xf32>
    %11 = vector.shape_cast %10 : vector<16x128xf32> to vector<2x8x128xf32>
    %12 = arith.truncf %7 : vector<2x8x128xf32> to vector<2x8x128xbf16>
    %13 = arith.truncf %9 : vector<2x8x128xf32> to vector<2x8x128xbf16>
    "tpu.trace_start"() <{level = 10 : i32, message = "bqd,bkd->bqk"}> : () -> ()
    %cst_5 = arith.constant dense<0.000000e+00> : vector<2x8x8xf32>
    %14 = tpu.matmul %12, %13, %cst_5 {dimension_numbers = #tpu.dot_dimension_numbers<[2], [2], [1], [1], [0, 0, 0, 1, 1, 1], [0], [0]>} : vector<2x8x128xbf16>, vector<2x8x128xbf16>, vector<2x8x8xf32> -> vector<2x8x8xf32>
    "tpu.trace_stop"() : () -> ()
    %cst_6 = arith.constant dense<0xFF800000> : vector<2x8xf32>
    %15 = vector.multi_reduction <maximumf>, %14, %cst_6 [2] : vector<2x8x8xf32> to vector<2x8xf32>
    %16 = vector.shape_cast %15 : vector<2x8xf32> to vector<2x8x1xf32>
    %17 = vector.broadcast %16 : vector<2x8x1xf32> to vector<2x8x8xf32>
    %18 = arith.subf %14, %17 : vector<2x8x8xf32>
    %19 = math.exp %18 : vector<2x8x8xf32>
    %cst_7 = arith.constant dense<0.000000e+00> : vector<2x8xf32>
    %20 = vector.multi_reduction <add>, %19, %cst_7 [2] : vector<2x8x8xf32> to vector<2x8xf32>
    %21 = vector.shape_cast %20 : vector<2x8xf32> to vector<2x8x1xf32>
    %22 = arith.truncf %19 : vector<2x8x8xf32> to vector<2x8x8xbf16>
    %23 = arith.truncf %11 : vector<2x8x128xf32> to vector<2x8x128xbf16>
    "tpu.trace_start"() <{level = 10 : i32, message = "bqk,bkd->bqd"}> : () -> ()
    %cst_8 = arith.constant dense<0.000000e+00> : vector<2x8x128xf32>
    %24 = tpu.matmul %22, %23, %cst_8 {dimension_numbers = #tpu.dot_dimension_numbers<[2], [1], [1], [2], [0, 0, 0, 1, 1, 2], [0], [0]>} : vector<2x8x8xbf16>, vector<2x8x128xbf16>, vector<2x8x128xf32> -> vector<2x8x128xf32>
    "tpu.trace_stop"() : () -> ()
    %25 = tpu.reciprocal %21 : vector<2x8x1xf32> -> vector<2x8x1xf32>
    %26 = vector.broadcast %25 : vector<2x8x1xf32> to vector<2x8x128xf32>
    %27 = arith.mulf %24, %26 : vector<2x8x128xf32>
    %28 = vector.extract_strided_slice %27 {offsets = [0, 0, 0], sizes = [2, 8, 16], strides = [1, 1, 1]} : vector<2x8x128xf32> to vector<2x8x16xf32>
    %c0_9 = arith.constant 0 : index
    %c0_10 = arith.constant 0 : index
    %c0_11 = arith.constant 0 : index
    %29 = vector.load %arg4[%c0_9, %c0_10, %c0_11] : memref<2x8x16xf32, #tpu.memory_space<vmem>>, vector<2x8x16xf32>
    tpu.vector_store %arg4[%c0_9, %c0_10, %c0_11], %28 {strides = array<i32>} : memref<2x8x16xf32, #tpu.memory_space<vmem>>, vector<2x8x16xf32>,
    return
  }
  func.func @transform_0(%arg0: i32) -> (i32, i32) {
    %c0_i32 = arith.constant 0 : i32
    %c0_i32_0 = arith.constant 0 : i32
    %c0_i32_1 = arith.constant 0 : i32
    return %c0_i32, %c0_i32_0 : i32, i32
  }
  func.func @transform_1(%arg0: i32) -> (i32, i32) {
    %c0_i32 = arith.constant 0 : i32
    %c0_i32_0 = arith.constant 0 : i32
    %c0_i32_1 = arith.constant 0 : i32
    return %c0_i32, %c0_i32_0 : i32, i32
  }
  func.func @transform_2(%arg0: i32) -> (i32, i32) {
    %c0_i32 = arith.constant 0 : i32
    %c0_i32_0 = arith.constant 0 : i32
    %c0_i32_1 = arith.constant 0 : i32
    return %c0_i32, %c0_i32_0 : i32, i32
  }
  func.func @transform_3(%arg0: i32) -> (i32, i32, i32) {
    %c0_i32 = arith.constant 0 : i32
    %c0_i32_0 = arith.constant 0 : i32
    %c0_i32_1 = arith.constant 0 : i32
    %c0_i32_2 = arith.constant 0 : i32
    return %c0_i32, %c0_i32_0, %c0_i32_1 : i32, i32, i32
  }
}

</mosaic_0001>

<bundles_post_ra>
// kernel: tpu_custom_call.1
= control target key start
LH: loop header
LB: loop body
LE: loop exit
PB: predicated region body
PF: predicated region fallthrough
CT: control target
= control target key end

     0   :  { %8 = vsyncpa [#allocation3], 0  ;;  %s625_s0 = inlined_call_operand.hbm [shape: bf16[16,32], index: 0, kind: input, shape index: {}]   ;;  %s626_s1 = inlined_call_operand.hbm [shape: bf16[32,384], index: 1, kind: input, shape index: {}]   ;;  %s627_s2 = inlined_call_operand.vmem [shape: f32[1,384], index: 2, kind: input, shape index: {}]   ;;  %s628_s3 = inlined_call_operand.hbm [shape: f32[2,8,16], index: 3, kind: output, shape index: {}]  }
   0x1   :  { %9 = vsyncpa [#allocation6], 0 }
   0x2   :  { %10 = vsyncpa [#allocation4], 0  ;;  %s570_s12 = smov [#allocation2]  }
   0x3   :  { %s16_s13 = sshll.u32 %s570_s12, 4  ;;  %s17_s13 = int_to_ptr.vmem [resolvable:$true] %s16_s13 }
   0x4   :  { %s512_s14 = scalar_lea.vmem %s17_s13, 128  ;;  %p517_p1 = scmp.lt.s32.totalorder %s17_s13, %s17_s13 }
   0x5   :  { %p513_p0 = scmp.ne.s32.totalorder %s17_s13, %s512_s14  ;;  %p518_p2 = scmp.lt.s32.totalorder %s512_s14, %s512_s14 }
   0x7   :  { %p519_p3 = por %p518_p2, %p517_p1 }
   0x9   :  { %p520_p4 = pnand %p519_p3, %p513_p0 }
   0xb   :  { %523 = shalt.err (!%p520_p4)
}
   0xc   :  { %s571_s15 = smov 64   ;;  %s572_s16 = smov 4  }
   0xd   :  { %22 = dma.hbm_to_vmem [thread:$0]  %s625_s0, 128, %s17_s13, [#allocation3], %s571_s15, %s571_s15, %s572_s16  }
   0xe   :  { %s573_s19 = smov [#allocation5]  }
   0xf   :  { %s28_s20 = sshll.u32 %s573_s19, 4  ;;  %s29_s20 = int_to_ptr.vmem [resolvable:$true] %s28_s20 }
  0x10   :  { %s532_s21 = scalar_lea.vmem %s29_s20, 768  ;;  %p537_p6 = scmp.lt.s32.totalorder %s29_s20, %s29_s20 }
  0x11   :  { %p533_p5 = scmp.ne.s32.totalorder %s29_s20, %s532_s21  ;;  %p538_p7 = scmp.lt.s32.totalorder %s532_s21, %s532_s21 }
  0x13   :  { %p539_p8 = por %p538_p7, %p537_p6 }
  0x15   :  { %p540_p9 = pnand %p539_p8, %p533_p5 }
  0x17   :  { %543 = shalt.err (!%p540_p9)
}
  0x18   :  { %s574_s22 = smov 192   ;;  %s575_s23 = smov 12  }
  0x19   :  { %34 = dma.hbm_to_vmem [thread:$0]  %s626_s1, 768, %s29_s20, [#allocation6], %s574_s22, %s574_s22, %s575_s23  }
  0x1a   :  { %564 = dma.done.wait [#allocation3], 128  }
  0x1b   :  { %565 = vsyncadd [#allocation3], 4294967168 }
  0x1c   :  { %566 = dma.done.wait [#allocation6], 768  }
  0x1d   :  { %567 = vsyncadd [#allocation6], 4294966528  ;;  %v576_v0 = vmov 0   ;;  %v577_v1 = vmov 0.0   ;;  %v487_v2 = vld [vmem:[#allocation5 + $0x1c] ss:$12 sps:$4 sm:$0xff]   ;;  %v56_v9 = vlaneseq }
  0x1e   :  { %144 = vmatprep.mubr.bf16.mxu0 %v576_v0  ;;  %443 = vmatprep.subr.bf16.mxu1 %v577_v1  ;;  %v489_v3 = vld [vmem:[#allocation5 + $0x18] ss:$12 sps:$4 sm:$0xff]   ;;  %v492_v5 = vld [vmem:[#allocation5] ss:$12 sps:$4 sm:$0xff]   ;;  %vm108_vm0 = vcmask 261120   ;;  %vm578_vm1 = vmmov 0  }
  0x1f   :  { %124 = vmatprep.subr.bf16.mxu0 %v487_v2  ;;  %v490_v4 = vld [vmem:[#allocation5 + $0x4] ss:$12 sps:$4 sm:$0xff]   ;;  %v494_v6 = vld [vmem:[#allocation5 + $0x20] ss:$12 sps:$4 sm:$0xff]   ;;  %v493_v7 = vld [vmem:[#allocation2] sm:$0xff]   ;;  %447 = vmatprep.mubr.msk.bf16.mxu1 %vm578_vm1, %v577_v1  ;;  %v57_v10 = vshrl.u32 %v56_v9, 7 }
  0x20   :  { %125 = vmatpush1.bf16.msra.mxu0 %v489_v3  ;;  %444 = vmatpush3.bf16.msra.mxu1 %v494_v6  ;;  %v495_v8 = vld [vmem:[#allocation5 + $0x8] ss:$12 sps:$4 sm:$0xff]   ;;  %v54_v12 = vld [vmem:[%s627_s2] sm:$0x7]  ;;  %vm306_vm2 = vcmask 1043456   ;;  %vm280_vm3 = vcmask 64512  }
  0x21   :  { %126 = vmatprep.subr.bf16.mxu0 %v490_v4  ;;  %445 = vmatprep.subr.bf16.mxu1 %v577_v1  ;;  %v62_v11 = vsub.s32 1, %v57_v10  ;;  %v58_v14 = vsub.s32 0, %v57_v10  ;;  %v66_v28 = vsub.s32 2, %v57_v10  ;;  %vm400_vm4 = vcmask 130048   ;;  %s579_s2 = smov [#allocation7]  }
  0x22   :  { %s408_s26 = sshll.u32 %s579_s2, 4  ;;  %s409_s26 = int_to_ptr.vmem [resolvable:$true] %s408_s26 }
  0x23   :  { %v63_v13 = vrot.slane %v54_v12, %v62_v11  ;;  %v59_v18 = vrot.slane %v54_v12, %v58_v14  ;;  %v67_v29 = vrot.slane %v54_v12, %v66_v28  ;;  %s544_s27 = scalar_lea.vmem %s409_s26, 256  ;;  %p549_p11 = scmp.lt.s32.totalorder %s409_s26, %s409_s26 }
  0x24   :  { %127 = vmatpush1.bf16.msra.mxu0 %v492_v5  ;;  %446 = vmatpush3.bf16.msra.mxu1 %v495_v8  ;;  %p545_p10 = scmp.ne.s32.totalorder %s409_s26, %s544_s27  ;;  %p550_p12 = scmp.lt.s32.totalorder %s544_s27, %s544_s27 }
  0x25   :  { %451 = vmatprep.subr.bf16.mxu0 %v577_v1  ;;  %457 = vmatprep.subr.bf16.mxu1 %v577_v1 }
  0x26   :  { %p551_p13 = por %p550_p12, %p549_p11 }
  0x27   :  { %428 = vmatmul.mubr.msk.bf16.vlgmr.msra.gmra.mxu0 %vm108_vm0, %v493_v7  ;;  %448 = vmatmul.mubr.msk.bf16.vlgmr.msra.gmra.mxu1 %vm108_vm0, %v493_v7 }
  0x28   :  { %453 = vmatprep.mubr.msk.bf16.mxu0 %vm578_vm1, %v577_v1  ;;  %459 = vmatprep.mubr.msk.bf16.mxu1 %vm578_vm1, %v577_v1  ;;  %p552_p0 = pnand %p551_p13, %p545_p10 }
  0xe7   :  { %v146_v15 = vpop.f32.mrf.mxu0  ;;  %v189_v30 = vpop.f32.mrf.mxu1 }
  0xe8   :  { %v147_v23 = vadd.f32 %v146_v15, %v59_v18  ;;  %v190_v31 = vadd.f32 %v189_v30, %v67_v29 }
  0xe9   :  { %v148_v16 = vpop.f32.mrf.mxu0  ;;  %v449_v32 = vpop.f32.mrf.mxu1 }
  0xea   :  { %v149_v17 = vadd.f32 %v148_v16, %v63_v13  ;;  %v196_v25 = vpack.c.bf16 %v147_v23, %v147_v23  ;;  %v301_v33 = vpack.c.bf16 %v190_v31, %v190_v31 }
  0xeb   :  { %v150_v19 = vpop.f32.mrf.mxu0  ;;  %v192_v34 = vpop.f32.mrf.mxu1 }
  0xec   :  { %v198_v20 = vpack.c.bf16 %v149_v17, %v149_v17  ;;  %v151_v26 = vadd.f32 %v150_v19, %v59_v18  ;;  %v308_v35 = vsel %vm306_vm2, %v301_v33, 0  ;;  %v193_v36 = vadd.f32 %v192_v34, %v67_v29 }
  0xed   :  { %v152_v21 = vpop.f32.mrf.mxu0  ;;  %v450_v37 = vpop.f32.mrf.mxu1 }
  0xee   :  { %v153_v22 = vadd.f32 %v152_v21, %v63_v13  ;;  %452 = vmatpush3.bf16.xpose.msra.mxu0 %v198_v20  ;;  %v197_v27 = vpack.c.bf16 %v151_v26, %v151_v26  ;;  %v302_v38 = vpack.c.bf16 %v193_v36, %v193_v36 }
  0xef   :  { %463 = vmatprep.subr.bf16.mxu0 %v577_v1 }
  0xf0   :  { %v199_v24 = vpack.c.bf16 %v153_v22, %v153_v22  ;;  %v354_v39 = vsel %vm306_vm2, %v302_v38, 0 }
  0xf2   :  { %458 = vmatpush3.bf16.xpose.msra.mxu1 %v199_v24 }
  0xf3   :  { %469 = vmatprep.subr.bf16.mxu1 %v577_v1 }
  0xf5   :  { %454 = vmatmul.mubr.bf16.vlgmr.msra.gmra.mxu0 %v196_v25 }
  0xf6   :  { %465 = vmatprep.mubr.msk.bf16.mxu0 %vm578_vm1, %v577_v1  ;;  %464 = vmatpush3.bf16.msra.mxu0 %v308_v35 }
  0xf9   :  { %460 = vmatmul.mubr.bf16.vlgmr.msra.gmra.mxu1 %v197_v27 }
  0xfa   :  { %471 = vmatprep.mubr.msk.bf16.mxu1 %vm578_vm1, %v577_v1  ;;  %470 = vmatpush3.bf16.msra.mxu1 %v354_v39 }
 0x1b5   :  { %v234_v40 = vpop.f32.mrf.mxu0 }
 0x1b6   :  { %v281_v41 = vsel %vm280_vm3, %v234_v40, -inf }
 0x1b7   :  { %282 = vmax.xlane.f32.xlu0 %v281_v41  ;;  %v455_v42 = vpop.f32.mrf.mxu0 }
 0x1b9   :  { %v237_v43 = vpop.f32.mrf.mxu0  ;;  %v274_v44 = vpop.f32.mrf.mxu1 }
 0x1ba   :  { %v284_v45 = vsel %vm280_vm3, %v274_v44, -inf }
 0x1bb   :  { %v461_v46 = vpop.f32.mrf.mxu1  ;;  %285 = vmax.xlane.f32.xlu0 %v284_v45  ;;  %v456_v47 = vpop.f32.mrf.mxu0 }
 0x1bd   :  { %v277_v48 = vpop.f32.mrf.mxu1 }
 0x1bf   :  { %v462_v49 = vpop.f32.mrf.mxu1 }
 0x240   :  { %v283_v50 = vpop.xlane.xlu0 %282 }
 0x241   :  { %v287_v51 = vsub.f32 %v234_v40, %v283_v50 }
 0x243   :  { %v289_v52 = vmul.f32 1.442695, %v287_v51 }
 0x244   :  { %v286_v53 = vpop.xlane.xlu0 %285 }
 0x245   :  { %496 = vpow2.f32 %v289_v52  ;;  %v288_v54 = vsub.f32 %v274_v44, %v286_v53 }
 0x247   :  { %v291_v55 = vmul.f32 1.442695, %v288_v54 }
 0x249   :  { %498 = vpow2.f32 %v291_v55 }
 0x252   :  { %v497_v56 = vpop.eup %496 }
 0x253   :  { %v293_v57 = vsel %vm280_vm3, %v497_v56, 0.0  ;;  %v299_v58 = vpack.c.bf16 %v497_v56, %v497_v56 }
 0x254   :  { %294 = vadd.xlane.f32.xlu1 %v293_v57 }
 0x255   :  { %466 = vmatmul.mubr.msk.bf16.vlgmr.msra.gmra.mxu0 %vm280_vm3, %v299_v58 }
 0x256   :  { %v499_v59 = vpop.eup %498 }
 0x257   :  { %v296_v60 = vsel %vm280_vm3, %v499_v59, 0.0  ;;  %v300_v61 = vpack.c.bf16 %v499_v59, %v499_v59 }
 0x258   :  { %297 = vadd.xlane.f32.xlu1 %v296_v60 }
 0x259   :  { %472 = vmatmul.mubr.msk.bf16.vlgmr.msra.gmra.mxu1 %vm280_vm3, %v300_v61 }
 0x2dd   :  { %v295_v62 = vpop.xlane.xlu1 %294 }
 0x2de   :  { %500 = vrcp.f32 %v295_v62 }
 0x2e1   :  { %v298_v63 = vpop.xlane.xlu1 %297 }
 0x2e2   :  { %502 = vrcp.f32 %v298_v63 }
 0x2eb   :  { %v501_v0 = vpop.eup %500 }
 0x2ef   :  { %v503_v4 = vpop.eup %502 }
 0x315   :  { %v344_v1 = vpop.f32.mrf.mxu0 }
 0x316   :  { %v398_v2 = vmul.f32 %v501_v0, %v344_v1 }
 0x317   :  { %v467_v3 = vpop.f32.mrf.mxu0 }
 0x318   :  { %401 = vst.msk [vmem:[#allocation7] sm:$0xff] %vm400_vm4, %v398_v2 }
 0x319   :  { %v347_v5 = vpop.f32.mrf.mxu0  ;;  %v390_v6 = vpop.f32.mrf.mxu1 }
 0x31a   :  { %v399_v7 = vmul.f32 %v503_v4, %v390_v6 }
 0x31b   :  { %v468_v8 = vpop.f32.mrf.mxu0  ;;  %v473_v9 = vpop.f32.mrf.mxu1 }
 0x31c   :  { %402 = vst.msk [vmem:[#allocation7 + $0x8] sm:$0xff] %vm400_vm4, %v399_v7 }
 0x31d   :  { %v393_v10 = vpop.f32.mrf.mxu1 }
 0x31e   :  { %555 = shalt.err (!%p552_p0)
}
 0x31f   :  { %s580_s28 = smov 128   ;;  %s581_s29 = smov 8   ;;  %v474_v11 = vpop.f32.mrf.mxu1 }
 0x320   :  { %414 = dma.vmem_to_hbm [thread:$0]  %s409_s26, 256, %s628_s3, [#allocation4], %s580_s28, %s580_s28, %s581_s29  }
 0x321   :  { %568 = dma.done.wait [#allocation4], 256  }
 0x322   :  { %569 = vsyncadd [#allocation4], 4294967040 }
 0x323   :  { %418 = vsyncpa [#allocation3], 1 }
 0x324   :  { %419 = vsyncpa [#allocation6], 1 }
 0x325   :  { %420 = vsyncpa [#allocation4], 1 }

</bundles_post_ra>
